<compile_context>
chip_gen: v7x
topology: tpu7x:2x2x1
jax: 0.10.0
libtpu: 0.0.40
codegen_flags: <defaults>
</compile_context>

<pallas_src>
import functools

import jax
import jax.numpy as jnp
from jax.experimental import pallas as pl
from jax.experimental.pallas import tpu as pltpu


def g2f_kernel(logit_ref, graph_ref, convw_ref, gamma_ref, beta_ref,
               mean_ref, var_ref, out_ref, *, eps):
    # logit_ref: (B, K, N)   graph_ref: (B, K, H)   convw_ref: (C, H)
    # gamma/beta/mean/var  : (C, 1)                 out_ref  : (B, C, N)

    # --- fold BatchNorm (eval-mode running stats) into the conv weight -----
    scale = gamma_ref[...] * jax.lax.rsqrt(var_ref[...] + eps)       # (C, 1)
    shift = beta_ref[...] - mean_ref[...] * scale                    # (C, 1)
    w_scaled = convw_ref[...].astype(jnp.float32) * scale            # (C, H)

    B = out_ref.shape[0]
    for b in range(B):                                # static unroll (B == 2)
        # softmax over nodes (sublane axis K). exp on EUP; approximate
        # reciprocal also on the (otherwise idle) EUP slot.
        logits = logit_ref[b].astype(jnp.float32)                    # (K, N)
        m = jnp.max(logits, axis=0, keepdims=True)                   # (1, N)
        e = jnp.exp(logits - m)                                      # (K, N)
        p = e * pl.reciprocal(jnp.sum(e, axis=0, keepdims=True), approx=True)

        # tiny per-batch combine, with the BN shift folded in: since the
        # softmax columns sum to ~1,  (comb + shift) @ p  ==  comb @ p + shift.
        g = graph_ref[b].astype(jnp.float32)                         # (K, H)
        comb = jnp.dot(w_scaled, g.T,
                       preferred_element_type=jnp.float32) + shift   # (C, K)

        # single big MXU matmul: (C, K) @ (K, N) -> (C, N), then ReLU + store.
        y = jnp.dot(comb, p, preferred_element_type=jnp.float32)     # (C, N)
        out_ref[b] = jnp.maximum(y, 0.0).astype(out_ref.dtype)


def graph_to_featuremaps(graph, fea_logit, conv_w, bn_gamma, bn_beta,
                         bn_mean, bn_var, eps=1e-5):
    """graph: (B, nodes, hidden), fea_logit: (B, nodes, h, w),
    conv_w: (out_ch, hidden) (squeezed 1x1 conv weight).
    Returns (B, out_ch, h, w). BatchNorm is applied in inference mode."""
    B, K, h, w = fea_logit.shape
    C, H = conv_w.shape
    N = h * w

    # glue (no transpose, no full-array astype): NCHW logits -> (B, K, N)
    logits = fea_logit.reshape(B, K, N)

    # tiny param reshapes only (metadata); all folding happens in the kernel.
    def col(v):
        return v.reshape(C, 1).astype(jnp.float32)

    kernel = functools.partial(g2f_kernel, eps=float(eps))

    out = pl.pallas_call(
        kernel,
        # output dtype follows the input dtype (bf16 logits -> bf16 writeback)
        out_shape=jax.ShapeDtypeStruct((B, C, N), fea_logit.dtype),
        grid_spec=pltpu.PrefetchScalarGridSpec(
            num_scalar_prefetch=0,
            grid=(1,),                     # single step: whole problem at once
            in_specs=[
                pl.BlockSpec((B, K, N), lambda i: (0, 0, 0)),   # logits
                pl.BlockSpec((B, K, H), lambda i: (0, 0, 0)),   # graph
                pl.BlockSpec((C, H), lambda i: (0, 0)),         # conv_w
                pl.BlockSpec((C, 1), lambda i: (0, 0)),         # bn_gamma
                pl.BlockSpec((C, 1), lambda i: (0, 0)),         # bn_beta
                pl.BlockSpec((C, 1), lambda i: (0, 0)),         # bn_mean
                pl.BlockSpec((C, 1), lambda i: (0, 0)),         # bn_var
            ],
            out_specs=pl.BlockSpec((B, C, N), lambda i: (0, 0, 0)),
        ),
        compiler_params=pltpu.CompilerParams(
            dimension_semantics=("arbitrary",)),
    )(logits, graph, conv_w, col(bn_gamma), col(bn_beta),
      col(bn_mean), col(bn_var))

    # glue (no transpose): (B, C, N) -> (B, C, h, w)
    return out.reshape(B, C, h, w)


def reference(graph, fea_logit, conv_w, bn_gamma, bn_beta, bn_mean, bn_var,
              eps=1e-5):
    """Pure-JAX reference mirroring the PyTorch forward (BN in eval mode)."""
    B, K, h, w = fea_logit.shape
    p = jax.nn.softmax(fea_logit, axis=1).reshape(B, K, h * w)
    p = jnp.transpose(p, (0, 2, 1))                                 # (B, N, K)
    fea = jnp.einsum("bnk,bkh->bnh", p, graph)                      # (B, N, H)
    fea = jnp.transpose(fea, (0, 2, 1)).reshape(B, -1, h, w)        # (B, H, h, w)
    y = jnp.einsum("ch,bhxy->bcxy", conv_w, fea)                    # 1x1 conv
    scale = (bn_gamma / jnp.sqrt(bn_var + eps))[None, :, None, None]
    shift = (bn_beta - bn_mean * bn_gamma / jnp.sqrt(bn_var + eps)
             )[None, :, None, None]
    return jnp.maximum(y * scale + shift, 0.0)


if __name__ == "__main__":
    key = jax.random.PRNGKey(0)
    B, nodes, h, w = 2, 8, 16, 16
    hidden_layers, output_channels = 32, 16

    k1, k2, k3, k4, k5 = jax.random.split(key, 5)
    graph = jax.random.normal(k1, (B, nodes, hidden_layers), jnp.float32)
    fea_logit = jax.random.normal(k2, (B, nodes, h, w), jnp.float32)

    # deterministic parameter init (synthetic, no checkpoint)
    conv_w = jax.random.normal(k3, (output_channels, hidden_layers),
                               jnp.float32) * (1.0 / jnp.sqrt(hidden_layers))
    bn_gamma = 1.0 + 0.1 * jax.random.normal(k4, (output_channels,), jnp.float32)
    bn_beta = 0.1 * jax.random.normal(k5, (output_channels,), jnp.float32)
    bn_mean = jnp.zeros((output_channels,), jnp.float32)
    bn_var = jnp.ones((output_channels,), jnp.float32)
    # TODO(synk): training-mode BatchNorm (batch statistics) not implemented;
    # the kernel folds inference-mode running stats into the conv weight/shift.

    fwd = jax.jit(graph_to_featuremaps)
    out = jax.block_until_ready(
        fwd(graph, fea_logit, conv_w, bn_gamma, bn_beta, bn_mean, bn_var))

    ref = reference(graph, fea_logit, conv_w, bn_gamma, bn_beta, bn_mean, bn_var)
    assert out.shape == (B, output_channels, h, w)
    # 2e-3 tolerance: the softmax denominator uses the EUP approximate
    # reciprocal (~1e-4-level relative error), which now also scales the
    # folded BN shift (negligible, ~1e-5 absolute); everything else is
    # f32-exact up to matmul-reassociation rounding.
    assert jnp.allclose(out, ref, atol=2e-3, rtol=2e-3), "mismatch vs reference"

    print("KERNEL_OK")
</pallas_src>

<mosaic_0001>
module attributes {stable_mosaic.version = 11 : i64} {
  func.func @g2f_kernel(%arg0: i32, %arg1: memref<2x8x256xf32, #tpu.memory_space<vmem>>, %arg2: memref<2x8x32xf32, #tpu.memory_space<vmem>>, %arg3: memref<16x32xf32, #tpu.memory_space<vmem>>, %arg4: memref<16x1xf32, #tpu.memory_space<vmem>>, %arg5: memref<16x1xf32, #tpu.memory_space<vmem>>, %arg6: memref<16x1xf32, #tpu.memory_space<vmem>>, %arg7: memref<16x1xf32, #tpu.memory_space<vmem>>, %arg8: memref<2x16x256xf32, #tpu.memory_space<vmem>>) attributes {dimension_semantics = [#tpu.dimension_semantics<arbitrary>], iteration_bounds = array<i64: 1>, scalar_prefetch = 0 : i64, scratch_operands = 0 : i64, tpu.core_type = #tpu.core_type<tc>, window_params = [{pipeline_mode = #tpu.pipeline_mode<synchronous>, transform_indices = @transform_0, window_bounds = array<i64: 2, 8, 256>}, {pipeline_mode = #tpu.pipeline_mode<synchronous>, transform_indices = @transform_1, window_bounds = array<i64: 2, 8, 32>}, {pipeline_mode = #tpu.pipeline_mode<synchronous>, transform_indices = @transform_2, window_bounds = array<i64: 16, 32>}, {pipeline_mode = #tpu.pipeline_mode<synchronous>, transform_indices = @transform_3, window_bounds = array<i64: 16, 1>}, {pipeline_mode = #tpu.pipeline_mode<synchronous>, transform_indices = @transform_4, window_bounds = array<i64: 16, 1>}, {pipeline_mode = #tpu.pipeline_mode<synchronous>, transform_indices = @transform_5, window_bounds = array<i64: 16, 1>}, {pipeline_mode = #tpu.pipeline_mode<synchronous>, transform_indices = @transform_6, window_bounds = array<i64: 16, 1>}, {pipeline_mode = #tpu.pipeline_mode<synchronous>, transform_indices = @transform_7, window_bounds = array<i64: 2, 16, 256>}]} {
    %c0 = arith.constant 0 : index
    %c0_0 = arith.constant 0 : index
    %0 = vector.load %arg4[%c0, %c0_0] : memref<16x1xf32, #tpu.memory_space<vmem>>, vector<16x1xf32>
    %c0_1 = arith.constant 0 : index
    %c0_2 = arith.constant 0 : index
    %1 = vector.load %arg7[%c0_1, %c0_2] : memref<16x1xf32, #tpu.memory_space<vmem>>, vector<16x1xf32>
    %cst = arith.constant 9.99999974E-6 : f32
    %2 = vector.broadcast %cst : f32 to vector<16x1xf32>
    %3 = arith.addf %1, %2 : vector<16x1xf32>
    %4 = math.rsqrt %3 : vector<16x1xf32>
    %5 = arith.mulf %0, %4 : vector<16x1xf32>
    %c0_3 = arith.constant 0 : index
    %c0_4 = arith.constant 0 : index
    %6 = vector.load %arg5[%c0_3, %c0_4] : memref<16x1xf32, #tpu.memory_space<vmem>>, vector<16x1xf32>
    %c0_5 = arith.constant 0 : index
    %c0_6 = arith.constant 0 : index
    %7 = vector.load %arg6[%c0_5, %c0_6] : memref<16x1xf32, #tpu.memory_space<vmem>>, vector<16x1xf32>
    %8 = arith.mulf %7, %5 : vector<16x1xf32>
    %9 = arith.subf %6, %8 : vector<16x1xf32>
    %c0_7 = arith.constant 0 : index
    %c0_8 = arith.constant 0 : index
    %10 = vector.load %arg3[%c0_7, %c0_8] : memref<16x32xf32, #tpu.memory_space<vmem>>, vector<16x32xf32>
    %11 = vector.broadcast %5 : vector<16x1xf32> to vector<16x32xf32>
    %12 = arith.mulf %10, %11 : vector<16x32xf32>
    %c0_9 = arith.constant 0 : index
    %c0_10 = arith.constant 0 : index
    %c0_11 = arith.constant 0 : index
    %13 = vector.load %arg1[%c0_9, %c0_10, %c0_11] : memref<2x8x256xf32, #tpu.memory_space<vmem>>, vector<1x8x256xf32>
    %14 = vector.shape_cast %13 : vector<1x8x256xf32> to vector<8x256xf32>
    %cst_12 = arith.constant dense<0xFF800000> : vector<256xf32>
    %15 = vector.multi_reduction <maximumf>, %14, %cst_12 [0] : vector<8x256xf32> to vector<256xf32>
    %16 = vector.shape_cast %15 : vector<256xf32> to vector<1x256xf32>
    %17 = vector.broadcast %16 : vector<1x256xf32> to vector<8x256xf32>
    %18 = arith.subf %14, %17 : vector<8x256xf32>
    %19 = math.exp %18 : vector<8x256xf32>
    %cst_13 = arith.constant dense<0.000000e+00> : vector<256xf32>
    %20 = vector.multi_reduction <add>, %19, %cst_13 [0] : vector<8x256xf32> to vector<256xf32>
    %21 = vector.shape_cast %20 : vector<256xf32> to vector<1x256xf32>
    %22 = tpu.reciprocal %21 {approx = true} : vector<1x256xf32> -> vector<1x256xf32>
    %23 = vector.broadcast %22 : vector<1x256xf32> to vector<8x256xf32>
    %24 = arith.mulf %19, %23 : vector<8x256xf32>
    %c0_14 = arith.constant 0 : index
    %c0_15 = arith.constant 0 : index
    %c0_16 = arith.constant 0 : index
    %25 = vector.load %arg2[%c0_14, %c0_15, %c0_16] : memref<2x8x32xf32, #tpu.memory_space<vmem>>, vector<1x8x32xf32>
    %26 = vector.shape_cast %25 : vector<1x8x32xf32> to vector<8x32xf32>
    %27 = tpu.transpose %26, [1, 0] : vector<8x32xf32> -> vector<32x8xf32>
    %cst_17 = arith.constant dense<0.000000e+00> : vector<16x8xf32>
    %28 = tpu.matmul %12, %27, %cst_17 {dimension_numbers = #tpu.dot_dimension_numbers<[1], [0], [0], [1], [0, 0, 1, 1], [], []>} : vector<16x32xf32>, vector<32x8xf32>, vector<16x8xf32> -> vector<16x8xf32>
    %29 = vector.broadcast %9 : vector<16x1xf32> to vector<16x8xf32>
    %30 = arith.addf %28, %29 : vector<16x8xf32>
    %cst_18 = arith.constant dense<0.000000e+00> : vector<16x256xf32>
    %31 = tpu.matmul %30, %24, %cst_18 {dimension_numbers = #tpu.dot_dimension_numbers<[1], [0], [0], [1], [0, 0, 1, 1], [], []>} : vector<16x8xf32>, vector<8x256xf32>, vector<16x256xf32> -> vector<16x256xf32>
    %cst_19 = arith.constant 0.000000e+00 : f32
    %32 = vector.broadcast %cst_19 : f32 to vector<16x256xf32>
    %33 = arith.maximumf %31, %32 : vector<16x256xf32>
    %c0_20 = arith.constant 0 : index
    %c0_21 = arith.constant 0 : index
    %c0_22 = arith.constant 0 : index
    %34 = vector.load %arg8[%c0_20, %c0_21, %c0_22] : memref<2x16x256xf32, #tpu.memory_space<vmem>>, vector<1x16x256xf32>
    %35 = vector.shape_cast %34 : vector<1x16x256xf32> to vector<16x256xf32>
    %36 = vector.shape_cast %33 : vector<16x256xf32> to vector<1x16x256xf32>
    tpu.vector_store %arg8[%c0_20, %c0_21, %c0_22], %36 {strides = array<i32>} : memref<2x16x256xf32, #tpu.memory_space<vmem>>, vector<1x16x256xf32>,
    %c1 = arith.constant 1 : index
    %c0_23 = arith.constant 0 : index
    %c0_24 = arith.constant 0 : index
    %37 = vector.load %arg1[%c1, %c0_23, %c0_24] : memref<2x8x256xf32, #tpu.memory_space<vmem>>, vector<1x8x256xf32>
    %38 = vector.shape_cast %37 : vector<1x8x256xf32> to vector<8x256xf32>
    %cst_25 = arith.constant dense<0xFF800000> : vector<256xf32>
    %39 = vector.multi_reduction <maximumf>, %38, %cst_25 [0] : vector<8x256xf32> to vector<256xf32>
    %40 = vector.shape_cast %39 : vector<256xf32> to vector<1x256xf32>
    %41 = vector.broadcast %40 : vector<1x256xf32> to vector<8x256xf32>
    %42 = arith.subf %38, %41 : vector<8x256xf32>
    %43 = math.exp %42 : vector<8x256xf32>
    %cst_26 = arith.constant dense<0.000000e+00> : vector<256xf32>
    %44 = vector.multi_reduction <add>, %43, %cst_26 [0] : vector<8x256xf32> to vector<256xf32>
    %45 = vector.shape_cast %44 : vector<256xf32> to vector<1x256xf32>
    %46 = tpu.reciprocal %45 {approx = true} : vector<1x256xf32> -> vector<1x256xf32>
    %47 = vector.broadcast %46 : vector<1x256xf32> to vector<8x256xf32>
    %48 = arith.mulf %43, %47 : vector<8x256xf32>
    %c1_27 = arith.constant 1 : index
    %c0_28 = arith.constant 0 : index
    %c0_29 = arith.constant 0 : index
    %49 = vector.load %arg2[%c1_27, %c0_28, %c0_29] : memref<2x8x32xf32, #tpu.memory_space<vmem>>, vector<1x8x32xf32>
    %50 = vector.shape_cast %49 : vector<1x8x32xf32> to vector<8x32xf32>
    %51 = tpu.transpose %50, [1, 0] : vector<8x32xf32> -> vector<32x8xf32>
    %cst_30 = arith.constant dense<0.000000e+00> : vector<16x8xf32>
    %52 = tpu.matmul %12, %51, %cst_30 {dimension_numbers = #tpu.dot_dimension_numbers<[1], [0], [0], [1], [0, 0, 1, 1], [], []>} : vector<16x32xf32>, vector<32x8xf32>, vector<16x8xf32> -> vector<16x8xf32>
    %53 = vector.broadcast %9 : vector<16x1xf32> to vector<16x8xf32>
    %54 = arith.addf %52, %53 : vector<16x8xf32>
    %cst_31 = arith.constant dense<0.000000e+00> : vector<16x256xf32>
    %55 = tpu.matmul %54, %48, %cst_31 {dimension_numbers = #tpu.dot_dimension_numbers<[1], [0], [0], [1], [0, 0, 1, 1], [], []>} : vector<16x8xf32>, vector<8x256xf32>, vector<16x256xf32> -> vector<16x256xf32>
    %cst_32 = arith.constant 0.000000e+00 : f32
    %56 = vector.broadcast %cst_32 : f32 to vector<16x256xf32>
    %57 = arith.maximumf %55, %56 : vector<16x256xf32>
    %c1_33 = arith.constant 1 : index
    %c0_34 = arith.constant 0 : index
    %c0_35 = arith.constant 0 : index
    %58 = vector.load %arg8[%c1_33, %c0_34, %c0_35] : memref<2x16x256xf32, #tpu.memory_space<vmem>>, vector<1x16x256xf32>
    %59 = vector.shape_cast %58 : vector<1x16x256xf32> to vector<16x256xf32>
    %60 = vector.shape_cast %57 : vector<16x256xf32> to vector<1x16x256xf32>
    tpu.vector_store %arg8[%c1_33, %c0_34, %c0_35], %60 {strides = array<i32>} : memref<2x16x256xf32, #tpu.memory_space<vmem>>, vector<1x16x256xf32>,
    return
  }
  func.func @transform_0(%arg0: i32) -> (i32, i32, i32) {
    %c0_i32 = arith.constant 0 : i32
    %c0_i32_0 = arith.constant 0 : i32
    %c0_i32_1 = arith.constant 0 : i32
    %c0_i32_2 = arith.constant 0 : i32
    return %c0_i32, %c0_i32_0, %c0_i32_1 : i32, i32, i32
  }
  func.func @transform_1(%arg0: i32) -> (i32, i32, i32) {
    %c0_i32 = arith.constant 0 : i32
    %c0_i32_0 = arith.constant 0 : i32
    %c0_i32_1 = arith.constant 0 : i32
    %c0_i32_2 = arith.constant 0 : i32
    return %c0_i32, %c0_i32_0, %c0_i32_1 : i32, i32, i32
  }
  func.func @transform_2(%arg0: i32) -> (i32, i32) {
    %c0_i32 = arith.constant 0 : i32
    %c0_i32_0 = arith.constant 0 : i32
    %c0_i32_1 = arith.constant 0 : i32
    return %c0_i32, %c0_i32_0 : i32, i32
  }
  func.func @transform_3(%arg0: i32) -> (i32, i32) {
    %c0_i32 = arith.constant 0 : i32
    %c0_i32_0 = arith.constant 0 : i32
    %c0_i32_1 = arith.constant 0 : i32
    return %c0_i32, %c0_i32_0 : i32, i32
  }
  func.func @transform_4(%arg0: i32) -> (i32, i32) {
    %c0_i32 = arith.constant 0 : i32
    %c0_i32_0 = arith.constant 0 : i32
    %c0_i32_1 = arith.constant 0 : i32
    return %c0_i32, %c0_i32_0 : i32, i32
  }
  func.func @transform_5(%arg0: i32) -> (i32, i32) {
    %c0_i32 = arith.constant 0 : i32
    %c0_i32_0 = arith.constant 0 : i32
    %c0_i32_1 = arith.constant 0 : i32
    return %c0_i32, %c0_i32_0 : i32, i32
  }
  func.func @transform_6(%arg0: i32) -> (i32, i32) {
    %c0_i32 = arith.constant 0 : i32
    %c0_i32_0 = arith.constant 0 : i32
    %c0_i32_1 = arith.constant 0 : i32
    return %c0_i32, %c0_i32_0 : i32, i32
  }
  func.func @transform_7(%arg0: i32) -> (i32, i32, i32) {
    %c0_i32 = arith.constant 0 : i32
    %c0_i32_0 = arith.constant 0 : i32
    %c0_i32_1 = arith.constant 0 : i32
    %c0_i32_2 = arith.constant 0 : i32
    return %c0_i32, %c0_i32_0, %c0_i32_1 : i32, i32, i32
  }
}

</mosaic_0001>

<bundles_post_ra>
// kernel: graph_to_featuremaps.1
= control target key start
LH: loop header
LB: loop body
LE: loop exit
PB: predicated region body
PF: predicated region fallthrough
CT: control target
= control target key end

     0   :  { %v554_v0 = vmov 0   ;;  %vm105_vm0 = vcmask 261120   ;;  %v555_v63 = vmov 0.0   ;;  %vm190_vm1 = vcmask 64512   ;;  %s692_s6 = inlined_call_operand.vmem [shape: f32[16,1], index: 6, kind: input, shape index: {}]   ;;  %s693_s3 = inlined_call_operand.vmem [shape: f32[16,1], index: 3, kind: input, shape index: {}]   ;;  %s694_s1 = inlined_call_operand.vmem [shape: f32[2,8,32], index: 1, kind: input, shape index: {}]   ;;  %s695_s4 = inlined_call_operand.vmem [shape: f32[16,1], index: 4, kind: input, shape index: {}]   ;;  %s696_s5 = inlined_call_operand.vmem [shape: f32[16,1], index: 5, kind: input, shape index: {}]   ;;  %s697_s0 = inlined_call_operand.vmem [shape: f32[2,8,256], index: 0, kind: input, shape index: {}]   ;;  %s698_s2 = inlined_call_operand.vmem [shape: f32[16,32], index: 2, kind: input, shape index: {}]   ;;  %s699_s7 = inlined_call_operand.vmem [shape: f32[2,16,256], index: 7, kind: output, shape index: {}]  }
   0x1   :  { %532 = vset.pattern.permute.xlu0 %v554_v0  ;;  %v28_v1 = vld [vmem:[%s692_s6] sm:$0xff]  ;;  %533 = vset.pattern.permute.xlu1 %v554_v0  ;;  %v29_v2 = vld [vmem:[%s692_s6 + $0x8] sm:$0xff] }
   0x2   :  { %v30_v3 = vadd.f32 1e-05, %v28_v1  ;;  %v31_v4 = vadd.f32 1e-05, %v29_v2  ;;  %v26_v5 = vld [vmem:[%s693_s3] sm:$0xff]  ;;  %v27_v7 = vld [vmem:[%s693_s3 + $0x8] sm:$0xff]  ;;  %267 = vmatprep.mubr.f32.mxu1 %v555_v63 }
   0x3   :  { %v94_v11 = vld [vmem:[%s694_s1] sm:$0xff]  ;;  %v39_v14 = vld [vmem:[%s696_s5 + $0x8] sm:$0xff] }
   0x4   :  { %534 = vrsqrt.f32 %v30_v3  ;;  %518 = vmatprep.subr.msk.mxu0 %vm105_vm0, %v94_v11  ;;  %v36_v12 = vld [vmem:[%s695_s4] sm:$0xff]  ;;  %v37_v16 = vld [vmem:[%s695_s4 + $0x8] sm:$0xff] }
   0x5   :  { %536 = vrsqrt.f32 %v31_v4  ;;  %519 = vmatpush3.xpose.msk.msra.mxu0 %vm105_vm0, %v94_v11  ;;  %v38_v13 = vld [vmem:[%s696_s5] sm:$0xff]  ;;  %v59_v20 = vld [vmem:[%s697_s0 + $0x8] sm:$0xff] }
   0x6   :  { %v58_v21 = vld [vmem:[%s697_s0] sm:$0xff]  ;;  %v66_v22 = vrot.slane %v59_v20, 4  ;;  %v45_v59 = vld [vmem:[%s698_s2 + $0x8] sm:$0xff] }
   0x7   :  { %v60_v23 = vrot.slane %v58_v21, 4  ;;  %v44_v56 = vld [vmem:[%s698_s2] sm:$0xff]  ;;  %v502_v62 = vld [vmem:[%s694_s1 + $0x8] sm:$0xff] }
   0x8   :  { %v67_v24 = vmax.f32 %v59_v20, %v66_v22 }
   0x9   :  { %v61_v25 = vmax.f32 %v58_v21, %v60_v23 }
   0xa   :  { %v68_v26 = vrot.slane %v67_v24, 2 }
   0xb   :  { %v62_v27 = vrot.slane %v61_v25, 2 }
   0xc   :  { %v69_v28 = vmax.f32 %v67_v24, %v68_v26 }
   0xd   :  { %v63_v29 = vmax.f32 %v61_v25, %v62_v27 }
   0xe   :  { %v535_v6 = vpop.eup %534  ;;  %v70_v30 = vrot.slane %v69_v28, 1 }
   0xf   :  { %v537_v8 = vpop.eup %536  ;;  %v34_v9 = vmul.f32 %v535_v6, %v26_v5  ;;  %v64_v31 = vrot.slane %v63_v29, 1  ;;  %v501_v6 = vld [vmem:[%s697_s0 + $0x18] sm:$0xff] }
  0x10   :  { %v35_v10 = vmul.f32 %v537_v8, %v27_v7  ;;  %v71_v32 = vmax.f32 %v69_v28, %v70_v30  ;;  %v291_v7 = vrot.slane %v501_v6, 4  ;;  %v500_v8 = vld [vmem:[%s697_s0 + $0x10] sm:$0xff] }
  0x11   :  { %48 = vperm.xlu0 %532, %v34_v9   ;;  %v40_v15 = vmul.f32 %v38_v13, %v34_v9  ;;  %v65_v33 = vmax.f32 %v63_v29, %v64_v31  ;;  %v285_v9 = vrot.slane %v500_v8, 4 }
  0x12   :  { %v41_v17 = vmul.f32 %v39_v14, %v35_v10  ;;  %v73_v34 = vsub.f32 %v59_v20, %v71_v32 }
  0x13   :  { %v42_v18 = vsub.f32 %v36_v12, %v40_v15  ;;  %v72_v35 = vsub.f32 %v58_v21, %v65_v33  ;;  %v286_v11 = vmax.f32 %v500_v8, %v285_v9 }
  0x14   :  { %v43_v19 = vsub.f32 %v37_v16, %v41_v17  ;;  %v76_v36 = vmul.f32 1.442695, %v73_v34 }
  0x15   :  { %53 = vperm.xlu0 %532, %v35_v10   ;;  %97 = vperm.xlu1 %533, %v42_v18   ;;  %v74_v37 = vmul.f32 1.442695, %v72_v35  ;;  %v292_v10 = vmax.f32 %v501_v6, %v291_v7  ;;  %v287_v13 = vrot.slane %v286_v11, 2 }
  0x16   :  { %538 = vpow2.f32 %v76_v36 }
  0x17   :  { %540 = vpow2.f32 %v74_v37  ;;  %v293_v12 = vrot.slane %v292_v10, 2  ;;  %v288_v15 = vmax.f32 %v286_v11, %v287_v13 }
  0x19   :  { %102 = vperm.xlu1 %533, %v43_v19   ;;  %v294_v14 = vmax.f32 %v292_v10, %v293_v12  ;;  %v289_v17 = vrot.slane %v288_v15, 1 }
  0x1b   :  { %v295_v16 = vrot.slane %v294_v14, 1  ;;  %v290_v19 = vmax.f32 %v288_v15, %v289_v17 }
  0x1d   :  { %v296_v18 = vmax.f32 %v294_v14, %v295_v16  ;;  %v297_v21 = vsub.f32 %v500_v8, %v290_v19 }
  0x1f   :  { %v298_v20 = vsub.f32 %v501_v6, %v296_v18  ;;  %v299_v23 = vmul.f32 1.442695, %v297_v21 }
  0x20   :  { %v539_v38 = vpop.eup %538 }
  0x21   :  { %v541_v39 = vpop.eup %540  ;;  %v84_v40 = vrot.slane %v539_v38, 4  ;;  %v301_v22 = vmul.f32 1.442695, %v298_v20 }
  0x22   :  { %v78_v41 = vrot.slane %v541_v39, 4 }
  0x23   :  { %v85_v42 = vadd.f32 %v539_v38, %v84_v40 }
  0x24   :  { %v79_v43 = vadd.f32 %v541_v39, %v78_v41 }
  0x25   :  { %v86_v44 = vrot.slane %v85_v42, 2 }
  0x26   :  { %v80_v45 = vrot.slane %v79_v43, 2 }
  0x27   :  { %v87_v46 = vadd.f32 %v86_v44, %v85_v42 }
  0x28   :  { %v81_v47 = vadd.f32 %v80_v45, %v79_v43 }
  0x29   :  { %v88_v48 = vrot.slane %v87_v46, 1 }
  0x2a   :  { %v82_v49 = vrot.slane %v81_v47, 1 }
  0x2b   :  { %v89_v50 = vadd.f32 %v88_v48, %v87_v46 }
  0x2c   :  { %v83_v51 = vadd.f32 %v82_v49, %v81_v47 }
  0x2d   :  { %542 = vrcp.f32 %v89_v50 }
  0x2e   :  { %544 = vrcp.f32 %v83_v51 }
  0x2f   :  { %546 = vpow2.f32 %v301_v22 }
  0x30   :  { %548 = vpow2.f32 %v299_v23 }
  0x37   :  { %v543_v52 = vpop.eup %542 }
  0x38   :  { %v545_v53 = vpop.eup %544  ;;  %v93_v54 = vmul.f32 %v543_v52, %v539_v38 }
  0x39   :  { %v92_v55 = vmul.f32 %v545_v53, %v541_v39  ;;  %v547_v24 = vpop.eup %546 }
  0x3a   :  { %197 = vmatprep.subr.mxu0 %v93_v54  ;;  %528 = vmatprep.subr.mxu1 %v93_v54  ;;  %v549_v25 = vpop.eup %548  ;;  %v309_v26 = vrot.slane %v547_v24, 4 }
  0x3b   :  { %529 = vmatpush1.msra.mxu1 %v92_v55  ;;  %v303_v27 = vrot.slane %v549_v25, 4 }
  0x3c   :  { %v310_v28 = vadd.f32 %v547_v24, %v309_v26 }
  0x3d   :  { %v304_v29 = vadd.f32 %v549_v25, %v303_v27 }
  0x3e   :  { %v311_v30 = vrot.slane %v310_v28, 2 }
  0x3f   :  { %v305_v31 = vrot.slane %v304_v29, 2 }
  0x40   :  { %v312_v32 = vadd.f32 %v311_v30, %v310_v28 }
  0x41   :  { %v306_v33 = vadd.f32 %v305_v31, %v304_v29 }
  0x42   :  { %v313_v34 = vrot.slane %v312_v32, 1 }
  0x43   :  { %v307_v35 = vrot.slane %v306_v33, 1 }
  0x44   :  { %v314_v36 = vadd.f32 %v313_v34, %v312_v32 }
  0x45   :  { %v308_v37 = vadd.f32 %v307_v35, %v306_v33 }
  0x46   :  { %550 = vrcp.f32 %v314_v36 }
  0x47   :  { %552 = vrcp.f32 %v308_v37 }
  0x50   :  { %v551_v38 = vpop.eup %550 }
  0x51   :  { %v553_v39 = vpop.eup %552  ;;  %v318_v40 = vmul.f32 %v551_v38, %v547_v24 }
  0x52   :  { %v317_v41 = vmul.f32 %v553_v39, %v549_v25 }
  0x53   :  { %405 = vmatprep.subr.mxu1 %v318_v40 }
  0x90   :  { %v49_v57 = vpop.permute.xlu0 %48 }
  0x91   :  { %v56_v58 = vmul.f32 %v49_v57, %v44_v56 }
  0x93   :  { %520 = vmatprep.mubr.msk.f32.mxu0 %vm105_vm0, %v56_v58 }
  0x94   :  { %v54_v60 = vpop.permute.xlu0 %53  ;;  %v645_v0 = vpop.permute.xlu1 %97 }
  0x95   :  { %v57_v61 = vmul.f32 %v54_v60, %v45_v59 }
  0x97   :  { %521 = vmatmul.mubr.msk.f32.vlgmr.msra.gmra.mrb[0].mxu0 %vm105_vm0, %v57_v61 }
  0x98   :  { %198 = vmatpush1.msra.mxu0 %v92_v55  ;;  %261 = vmatprep.mubr.f32.mxu0 %v555_v63  ;;  %v647_v1 = vpop.permute.xlu1 %102 }
  0x99   :  { %523 = vmatprep.subr.msk.mxu0 %vm105_vm0, %v502_v62 }
 0x16a   :  { %v522_v2 = vpop.f32.mrb[0].mxu0 }
 0x16b   :  { %v187_v3 = vadd.f32 %v522_v2, %v647_v1  ;;  %v181_v4 = vpop.f32.mrb[1].mxu0 }
 0x16c   :  { %v182_v5 = vadd.f32 %v181_v4, %v645_v0 }
 0x16d   :  { %499 = vmatmul.mubr.msk.f32.vlgmr.msra.gmra.mrb[0].mxu1 %vm190_vm1, %v187_v3 }
 0x16e   :  { %498 = vmatmul.mubr.msk.f32.vlgmr.msra.gmra.mrb[2].mxu0 %vm190_vm1, %v182_v5  ;;  %469 = vmatprep.mubr.f32.mxu1 %v555_v63 }
 0x16f   :  { %524 = vmatpush3.xpose.msk.msra.mxu0 %vm105_vm0, %v502_v62  ;;  %525 = vmatprep.mubr.msk.f32.mxu0 %vm105_vm0, %v56_v58 }
 0x170   :  { %406 = vmatpush1.msra.mxu1 %v317_v41 }
 0x172   :  { %526 = vmatmul.mubr.msk.f32.vlgmr.msra.gmra.mrb[4].mxu0 %vm105_vm0, %v57_v61 }
 0x240   :  { %v269_v42 = vpop.f32.mrb[0].mxu1 }
 0x241   :  { %v276_v43 = vmax.f32 %v269_v42, 0.0  ;;  %v263_v44 = vpop.f32.mrb[2].mxu0  ;;  %v271_v45 = vpop.f32.mrb[1].mxu1 }
 0x242   :  { %v274_v46 = vmax.f32 %v263_v44, 0.0  ;;  %v277_v47 = vmax.f32 %v271_v45, 0.0  ;;  %v265_v48 = vpop.f32.mrb[3].mxu0 }
 0x243   :  { %280 = vst [vmem:[%s699_s7 + $0x10] sm:$0xff] %v276_v43  ;;  %v275_v49 = vmax.f32 %v265_v48, 0.0 }
 0x244   :  { %278 = vst [vmem:[%s699_s7] sm:$0xff] %v274_v46  ;;  %281 = vst [vmem:[%s699_s7 + $0x18] sm:$0xff] %v277_v47 }
 0x245   :  { %279 = vst [vmem:[%s699_s7 + $0x8] sm:$0xff] %v275_v49  ;;  %v527_v50 = vpop.f32.mrb[4].mxu0 }
 0x246   :  { %v390_v51 = vpop.f32.mrb[5].mxu0  ;;  %v396_v53 = vadd.f32 %v527_v50, %v647_v1 }
 0x247   :  { %v391_v52 = vadd.f32 %v390_v51, %v645_v0 }
 0x249   :  { %506 = vmatmul.mubr.msk.f32.vlgmr.msra.gmra.mrb[2].mxu1 %vm190_vm1, %v391_v52 }
 0x24a   :  { %475 = vmatprep.mubr.f32.mxu1 %v555_v63 }
 0x24d   :  { %507 = vmatmul.mubr.msk.f32.gmra.mrb[4].mxu1 %vm190_vm1, %v396_v53 }
 0x31c   :  { %v471_v54 = vpop.f32.mrb[2].mxu1 }
 0x31d   :  { %v482_v55 = vmax.f32 %v471_v54, 0.0  ;;  %v473_v56 = vpop.f32.mrb[3].mxu1 }
 0x31e   :  { %v483_v57 = vmax.f32 %v473_v56, 0.0 }
 0x31f   :  { %508 = vst [vmem:[%s699_s7 + $0x20] sm:$0xff] %v482_v55 }
 0x320   :  { %509 = vst [vmem:[%s699_s7 + $0x28] sm:$0xff] %v483_v57  ;;  %v477_v58 = vpop.f32.mrb[4].mxu1 }
 0x321   :  { %v484_v59 = vmax.f32 %v477_v58, 0.0  ;;  %v479_v60 = vpop.f32.mrb[5].mxu1 }
 0x322   :  { %v485_v61 = vmax.f32 %v479_v60, 0.0 }
 0x323   :  { %510 = vst [vmem:[%s699_s7 + $0x30] sm:$0xff] %v484_v59 }
 0x324   :  { %511 = vst [vmem:[%s699_s7 + $0x38] sm:$0xff] %v485_v61 }

</bundles_post_ra>
